<compile_context>
chip_gen: v5e
topology: v5e:2x2
jax: 0.10.0
libtpu: 0.0.40
codegen_flags: <defaults>
</compile_context>

<pallas_src>
import numpy as np
import jax
import jax.numpy as jnp
from jax.experimental import pallas as pl
from jax.experimental.pallas import tpu as pltpu

LANE = 128
PER_SIDE = 24            # f32 slots per (edge, side) in the folded SMEM table
PER_EDGE = 2 * PER_SIDE  # 48


def _pick_area_tile(ar, target=1024):
    """Largest divisor of `ar` <= target, preferring multiples of 32 / 16 / 8
    (bf16 native sublane tile is 16)."""
    if ar <= target:
        return ar
    for gran in (32, 16, 8):
        start = target - (target % gran)
        for t in range(start, gran - 1, -gran):
            if ar % t == 0:
                return t
    return ar


# ----------------------------------------------------------------------------
# Fused Pallas kernel: depth->pts3d + aligned pred + weighted L2, per edge.
# grid = (n_edges, n_area_tiles); edge axis 'parallel', area axis 'arbitrary'.
# ----------------------------------------------------------------------------
def _fused_loss_kernel(ei_ref, ej_ref,              # scalar prefetch (SMEM, i32)
                       eparams_ref,                 # SMEM flat (n_edges*48,) f32
                       depth_i_ref, depth_j_ref,    # (1, AR, 128) f32, image-resident
                       grid_ref,                    # (2, AR, 128) f32, fully resident
                       pred_i_ref, pred_j_ref,      # (1, 3, TA, 128) bf16
                       w_i_ref, w_j_ref,            # (1, TA, 128) bf16
                       out_ref,                     # (1, 2, 8, 128) f32
                       acc_ref):                    # VMEM (2, 8, 128) f32
    e = pl.program_id(0)
    a = pl.program_id(1)
    ta = pred_i_ref.shape[2]

    @pl.when(a == 0)
    def _init():
        acc_ref[...] = jnp.zeros_like(acc_ref)

    # Read ALL per-edge scalars into locals first, before touching any vector
    # ref (keeps SMEM scalar loads off the post-DMA-wait path).
    base = e * PER_EDGE
    p = [eparams_ref[base + k] for k in range(PER_EDGE)]

    off = pl.multiple_of(a * ta, ta)
    gx = grid_ref[0, pl.ds(off, ta), :]              # (ta, 128)
    gy = grid_ref[1, pl.ds(off, ta), :]

    def one_side(depth_ref, pred_ref, w_ref, po, slot):
        # proj_r  = d * (A[r]*gx + B[r]*gy + C[r]) + T_im[r]        (folded 1/f, pp)
        # ali_r   = S'[r,0]*px + S'[r,1]*py + S'[r,2]*pz + sT[r]    (folded adapt)
        # dlt_r   = proj_r - ali_r = d*(...) - S'.p + dT[r],  dT = T_im - sT
        d = jnp.exp(depth_ref[0, pl.ds(off, ta), :])                 # (ta, 128)
        px = pred_ref[0, 0].astype(jnp.float32)
        py = pred_ref[0, 1].astype(jnp.float32)
        pz = pred_ref[0, 2].astype(jnp.float32)
        sq = None
        for r in range(3):
            m0 = p[po + 3 * r + 0]
            m1 = p[po + 3 * r + 1]
            m2 = p[po + 3 * r + 2]
            s0 = p[po + 9 + 3 * r + 0]
            s1 = p[po + 9 + 3 * r + 1]
            s2 = p[po + 9 + 3 * r + 2]
            dt = p[po + 18 + r]
            dlt = d * (m0 * gx + m1 * gy + m2) - (s0 * px + s1 * py + s2 * pz) + dt
            sq = dlt * dlt if sq is None else sq + dlt * dlt
        sq = sq * w_ref[0].astype(jnp.float32)
        if ta % 8 == 0:
            # VPU-only vreg adds; the cross-sublane reduce is deferred to XLA.
            acc_ref[slot] = acc_ref[slot] + sq.reshape(ta // 8, 8, LANE).sum(axis=0)
        else:
            acc_ref[slot, 0:1, :] = acc_ref[slot, 0:1, :] + jnp.sum(sq, axis=0, keepdims=True)

    one_side(depth_i_ref, pred_i_ref, w_i_ref, 0, 0)
    one_side(depth_j_ref, pred_j_ref, w_j_ref, PER_SIDE, 1)

    @pl.when(a == pl.num_programs(1) - 1)
    def _finalize():
        out_ref[0] = acc_ref[...]


# ----------------------------------------------------------------------------
# Plain-JAX glue (tiny pose / intrinsics math, as in the PyTorch properties)
# ----------------------------------------------------------------------------
def _quat_to_rotmat(q):  # (..., 4), XYZW (roma convention), normalized
    x, y, z, w = q[..., 0], q[..., 1], q[..., 2], q[..., 3]
    r0 = jnp.stack([1 - 2 * (y * y + z * z), 2 * (x * y - z * w), 2 * (x * z + y * w)], -1)
    r1 = jnp.stack([2 * (x * y + z * w), 1 - 2 * (x * x + z * z), 2 * (y * z - x * w)], -1)
    r2 = jnp.stack([2 * (x * z - y * w), 2 * (y * z + x * w), 1 - 2 * (x * x + y * y)], -1)
    return jnp.stack([r0, r1, r2], -2)


def _signed_expm1(x):
    return jnp.sign(x) * jnp.expm1(jnp.abs(x))


def _to_rigid(poses):  # to_rigid_unit_quaternion -> (R (N,3,3), T (N,3))
    q = poses[:, :4]
    q = q / jnp.linalg.norm(q, axis=-1, keepdims=True)
    T = _signed_expm1(poses[:, 4:7])
    return _quat_to_rotmat(q), T


def _pose_glue(pairwise_poses, pairwise_adaptors, image_poses, image_focals,
               image_principle_points, pp_buf, *, focal_break, pw_break, base_scale):
    # pw_poses (scaled rigid transform) + adaptors
    R_pw, T_pw = _to_rigid(pairwise_poses)
    log_s = pairwise_poses[:, -1]
    pw_scale = jnp.exp(log_s) * jnp.exp(jnp.log(base_scale) - jnp.mean(log_s))
    sR = pw_scale[:, None, None] * R_pw
    sT = pw_scale[:, None] * T_pw

    a_xy = pairwise_adaptors[:, 0:1]
    a_z = pairwise_adaptors[:, 1:2]
    a3 = jnp.concatenate([a_xy, a_xy, a_z], axis=-1)
    a3 = a3 - jnp.mean(a3, axis=1, keepdims=True)
    adapt = jnp.exp(a3 / pw_break)

    # im_poses + intrinsics
    R_im, T_im = _to_rigid(image_poses)
    focal = jnp.exp(image_focals[:, 0] / focal_break)
    pp = pp_buf + 10.0 * image_principle_points
    return sR, sT, adapt, R_im, T_im, focal, pp


def _fold_edge_params(sR, sT, adapt, R_im, T_im, focal, pp, ei, ej):
    """Flat (n_edges*48,) f32 SMEM table with focal / pp / adaptor / translation
    constants folded in. Per edge, per side (24 slots):
      [0:9]   M[r,c]  where proj_r = d*(M[r,0]*gx + M[r,1]*gy + M[r,2]) + T_im[r]
      [9:18]  S'[r,c] = sR[r,c]*adapt[c]
      [18:21] dT[r]   = T_im[r] - sT[r]
      [21:24] padding
    """
    n_edges = sR.shape[0]
    A = R_im[:, :, 0] / focal[:, None]                         # (n_imgs, 3)
    B = R_im[:, :, 1] / focal[:, None]
    C = R_im[:, :, 2] - A * pp[:, 0:1] - B * pp[:, 1:2]
    M = jnp.stack([A, B, C], axis=-1).reshape(-1, 9)           # (n_imgs, 9)
    Sp = (sR * adapt[:, None, :]).reshape(n_edges, 9)          # (n_edges, 9)
    zeros = jnp.zeros((n_edges, 3), jnp.float32)

    def side(img_idx):
        dT = T_im[img_idx] - sT                                # (n_edges, 3)
        return jnp.concatenate([M[img_idx], Sp, dT, zeros], axis=-1)   # (n_edges, 24)

    tab = jnp.concatenate([side(ei), side(ej)], axis=-1).astype(jnp.float32)
    return tab.reshape(-1)                                     # (n_edges*48,)


# ----------------------------------------------------------------------------
# One-time preparation of the constant (non-learnable) buffers.
# Called ONCE, outside the Adam optimization loop.
# ----------------------------------------------------------------------------
def prepare_static_inputs(grid_buf, stacked_pred_i, stacked_pred_j,
                          weight_i, weight_j, ei, ej,
                          *, storage_dtype=jnp.bfloat16):
    n_edges, area, _ = stacked_pred_i.shape
    assert area % LANE == 0, "image area must be a multiple of 128"
    ar = area // LANE

    # sort edges by ei so consecutive grid iterations can skip the depth_i DMA
    ei_np = np.asarray(ei)
    ej_np = np.asarray(ej)
    perm = np.argsort(ei_np, kind="stable").astype(np.int32)

    # single shared pixel grid (all images have the same shape here)
    grid0 = grid_buf[0] if grid_buf.ndim == 3 else grid_buf            # (area, 2)
    grid_r = jnp.transpose(grid0, (1, 0)).reshape(2, ar, LANE).astype(jnp.float32)

    def _pred(p):   # (n_edges, area, 3) -> (n_edges, 3, ar, 128), bf16 storage
        p = p[perm]
        return jnp.transpose(p, (0, 2, 1)).reshape(n_edges, 3, ar, LANE).astype(storage_dtype)

    def _w(w):      # (n_edges, area) -> (n_edges, ar, 128), bf16 storage
        return w[perm].reshape(n_edges, ar, LANE).astype(storage_dtype)

    return dict(
        ei=jnp.asarray(ei_np[perm], jnp.int32),
        ej=jnp.asarray(ej_np[perm], jnp.int32),
        perm=jnp.asarray(perm, jnp.int32),
        grid=grid_r,
        pred_i=_pred(stacked_pred_i),
        pred_j=_pred(stacked_pred_j),
        w_i=_w(weight_i),
        w_j=_w(weight_j),
    )


# ----------------------------------------------------------------------------
# Pallas wrapper == PointCloudOptimizer.forward()
# ----------------------------------------------------------------------------
def pointcloud_optimizer_forward(pairwise_poses, pairwise_adaptors, image_poses,
                                 image_depthmaps, image_focals, image_principle_points,
                                 pp_buf, prepared,
                                 *, focal_break=20.0, pw_break=20.0, base_scale=0.5,
                                 area_tile_target=1024):
    n_edges = prepared["pred_i"].shape[0]
    ar = prepared["grid"].shape[1]
    area = ar * LANE
    n_imgs = image_depthmaps.shape[0]

    sR, sT, adapt, R_im, T_im, focal, pp = _pose_glue(
        pairwise_poses, pairwise_adaptors, image_poses, image_focals,
        image_principle_points, pp_buf,
        focal_break=focal_break, pw_break=pw_break, base_scale=base_scale)

    # per-edge tables in the SORTED edge order used by the kernel
    perm = prepared["perm"]
    edge_tab = _fold_edge_params(sR[perm], sT[perm], adapt[perm],
                                 R_im, T_im, focal, pp,
                                 prepared["ei"], prepared["ej"])

    # learnable depthmaps: contiguous reshape only (no transpose), done per call
    depth_r = image_depthmaps.reshape(n_imgs, ar, LANE)

    ta = _pick_area_tile(ar, area_tile_target)
    n_a = ar // ta

    # VMEM budget (all blocks double-buffered by the runtime); stay well inside
    # v7x's 64 MiB physical / 32 MiB scoped per-TC budget.
    est = 2 * (2 * ar * LANE * 4            # depth_i + depth_j (f32, image-resident)
               + 2 * ar * LANE * 4          # pixel grid (f32, fully resident)
               + 2 * 3 * ta * LANE * 2      # pred_i + pred_j (bf16)
               + 2 * ta * LANE * 2          # w_i + w_j (bf16)
               + 2 * 8 * LANE * 4)          # output block
    vmem_limit = int(min(2 * est + (16 << 20), 48 << 20))

    out = pl.pallas_call(
        _fused_loss_kernel,
        out_shape=jax.ShapeDtypeStruct((n_edges, 2, 8, LANE), jnp.float32),
        grid_spec=pltpu.PrefetchScalarGridSpec(
            num_scalar_prefetch=2,
            grid=(n_edges, n_a),                       # reduction (area) axis last
            in_specs=[
                pl.BlockSpec(memory_space=pltpu.MemorySpace.SMEM),                 # folded params
                pl.BlockSpec((1, ar, LANE), lambda e, a, ei, ej: (ei[e], 0, 0)),   # depth_i (resident)
                pl.BlockSpec((1, ar, LANE), lambda e, a, ei, ej: (ej[e], 0, 0)),   # depth_j (resident)
                pl.BlockSpec((2, ar, LANE), lambda e, a, ei, ej: (0, 0, 0)),       # shared grid (resident)
                pl.BlockSpec((1, 3, ta, LANE), lambda e, a, ei, ej: (e, 0, a, 0)),  # pred_i
                pl.BlockSpec((1, 3, ta, LANE), lambda e, a, ei, ej: (e, 0, a, 0)),  # pred_j
                pl.BlockSpec((1, ta, LANE), lambda e, a, ei, ej: (e, a, 0)),        # w_i
                pl.BlockSpec((1, ta, LANE), lambda e, a, ei, ej: (e, a, 0)),        # w_j
            ],
            out_specs=pl.BlockSpec((1, 2, 8, LANE), lambda e, a, ei, ej: (e, 0, 0, 0)),
            scratch_shapes=[pltpu.VMEM((2, 8, LANE), jnp.float32)],
        ),
        compiler_params=pltpu.CompilerParams(
            dimension_semantics=("parallel", "arbitrary"),
            vmem_limit_bytes=vmem_limit),
    )(prepared["ei"], prepared["ej"], edge_tab,
      depth_r, depth_r, prepared["grid"],
      prepared["pred_i"], prepared["pred_j"], prepared["w_i"], prepared["w_j"])

    # tiny final reduction (n_edges x 2 x 8 x 128) in XLA
    per_edge = jnp.sum(out, axis=(2, 3))               # (n_edges, 2)
    # TODO(synk): total_area_i/j assumes uniform image shapes (as in this setup);
    # mixed-resolution DUSt3R inputs would need per-edge areas here.
    total_area_i = float(area) * n_edges
    total_area_j = float(area) * n_edges
    li = jnp.sum(per_edge[:, 0]) / total_area_i
    lj = jnp.sum(per_edge[:, 1]) / total_area_j
    return li + lj


# ----------------------------------------------------------------------------
# Pure-JAX reference (mirrors the PyTorch forward) for validation
# ----------------------------------------------------------------------------
def _reference_forward(pairwise_poses, pairwise_adaptors, image_poses, image_depthmaps,
                       image_focals, image_principle_points, pp_buf, grid_buf,
                       stacked_pred_i, stacked_pred_j, weight_i, weight_j, ei, ej,
                       *, focal_break=20.0, pw_break=20.0, base_scale=0.5):
    n_edges = pairwise_poses.shape[0]
    n_imgs, area = image_depthmaps.shape
    sR, sT, adapt, R_im, T_im, focal, pp = _pose_glue(
        pairwise_poses, pairwise_adaptors, image_poses, image_focals,
        image_principle_points, pp_buf,
        focal_break=focal_break, pw_break=pw_break, base_scale=base_scale)

    depth = jnp.exp(image_depthmaps)                                     # (n_imgs, A)
    rel_xy = depth[..., None] * (grid_buf - pp[:, None, :]) / focal[:, None, None]
    rel = jnp.concatenate([rel_xy, depth[..., None]], axis=-1)           # (n_imgs, A, 3)
    proj = jnp.sum(R_im[:, None, :, :] * rel[:, :, None, :], -1) + T_im[:, None, :]

    def aligned(pred):
        p = adapt[:, None, :] * pred
        return jnp.sum(sR[:, None, :, :] * p[:, :, None, :], -1) + sT[:, None, :]

    ai = aligned(stacked_pred_i)
    aj = aligned(stacked_pred_j)
    li = jnp.sum(jnp.sum((proj[ei] - ai) ** 2, -1) * weight_i) / (float(area) * n_edges)
    lj = jnp.sum(jnp.sum((proj[ej] - aj) ** 2, -1) * weight_j) / (float(area) * n_edges)
    return li + lj


# TODO(synk): global_alignment_loop (Adam iterations), MST/PnP init and the
# visualization helpers are host-side optimizer driver code, not part of
# forward(); they are intentionally not lowered to Pallas.
# TODO(synk): jax.grad through this pallas_call needs a custom_vjp backward
# kernel for end-to-end training; forward-pass semantics only here.

if __name__ == "__main__":
    key = jax.random.PRNGKey(0)
    H, W = 32, 64
    area = H * W                              # 2048 -> AR = 16 (multiple of 16)
    edges = [(0, 1), (1, 0), (1, 2), (2, 1)]
    n_edges = len(edges)
    n_imgs = 3
    focal_break = 20.0
    pw_break = 20.0
    base_scale = 0.5

    ks = jax.random.split(key, 8)
    # parameters / buffers, matching the module's __init__ (deterministic init)
    pairwise_poses = jax.random.normal(ks[0], (n_edges, 8), jnp.float32)
    pairwise_adaptors = jnp.zeros((n_edges, 2), jnp.float32)
    image_poses = jax.random.normal(ks[1], (n_imgs, 7), jnp.float32)
    image_depthmaps = jax.random.normal(ks[2], (n_imgs, area), jnp.float32) / 10.0 - 3.0
    image_focals = jnp.full((n_imgs, 1), focal_break * np.log(max(H, W)), jnp.float32)
    image_principle_points = jnp.zeros((n_imgs, 2), jnp.float32)
    pp_buf = jnp.tile(jnp.array([[W / 2.0, H / 2.0]], jnp.float32), (n_imgs, 1))

    ys, xs = jnp.meshgrid(jnp.arange(H, dtype=jnp.float32),
                          jnp.arange(W, dtype=jnp.float32), indexing="ij")
    grid1 = jnp.stack([xs, ys], axis=-1).reshape(area, 2)         # xy_grid(W, H) raveled
    grid_buf = jnp.tile(grid1[None], (n_imgs, 1, 1))

    stacked_pred_i = jax.random.normal(ks[3], (n_edges, area, 3), jnp.float32)
    stacked_pred_j = jax.random.normal(ks[4], (n_edges, area, 3), jnp.float32)
    conf_i = 1.0 + jax.random.uniform(ks[5], (n_edges, area), jnp.float32, 0.0, 2.0)
    conf_j = 1.0 + jax.random.uniform(ks[6], (n_edges, area), jnp.float32, 0.0, 2.0)
    weight_i = jnp.log(conf_i)   # conf='log' confidence transformation
    weight_j = jnp.log(conf_j)

    ei = jnp.array([i for i, j in edges], jnp.int32)
    ej = jnp.array([j for i, j in edges], jnp.int32)

    # ---- one-time layout / bf16-storage conversion (outside the Adam loop) ----
    prepared = prepare_static_inputs(grid_buf, stacked_pred_i, stacked_pred_j,
                                     weight_i, weight_j, ei, ej,
                                     storage_dtype=jnp.bfloat16)

    fwd = jax.jit(lambda *a: pointcloud_optimizer_forward(
        *a, focal_break=focal_break, pw_break=pw_break, base_scale=base_scale))
    loss = fwd(pairwise_poses, pairwise_adaptors, image_poses, image_depthmaps,
               image_focals, image_principle_points, pp_buf, prepared)
    loss = jax.block_until_ready(loss)

    # Reference consumes the same bf16-quantized stored values (storage choice),
    # so the comparison validates the kernel math itself.
    pred_i_q = stacked_pred_i.astype(jnp.bfloat16).astype(jnp.float32)
    pred_j_q = stacked_pred_j.astype(jnp.bfloat16).astype(jnp.float32)
    w_i_q = weight_i.astype(jnp.bfloat16).astype(jnp.float32)
    w_j_q = weight_j.astype(jnp.bfloat16).astype(jnp.float32)
    ref = _reference_forward(
        pairwise_poses, pairwise_adaptors, image_poses, image_depthmaps,
        image_focals, image_principle_points, pp_buf, grid_buf,
        pred_i_q, pred_j_q, w_i_q, w_j_q, ei, ej,
        focal_break=focal_break, pw_break=pw_break, base_scale=base_scale)
    ref = jax.block_until_ready(ref)

    assert np.isfinite(float(loss)), "non-finite loss"
    np.testing.assert_allclose(float(loss), float(ref), rtol=1e-3, atol=1e-3)
    print("KERNEL_OK")
</pallas_src>

<mosaic_0001>
module attributes {stable_mosaic.version = 11 : i64} {
  func.func @_fused_loss_kernel(%arg0: i32, %arg1: i32, %arg2: memref<4xi32, #tpu.memory_space<smem>>, %arg3: memref<4xi32, #tpu.memory_space<smem>>, %arg4: memref<192xf32, #tpu.memory_space<smem>>, %arg5: memref<1x16x128xf32, #tpu.memory_space<vmem>>, %arg6: memref<1x16x128xf32, #tpu.memory_space<vmem>>, %arg7: memref<2x16x128xf32, #tpu.memory_space<vmem>>, %arg8: memref<1x3x16x128xbf16, #tpu.memory_space<vmem>>, %arg9: memref<1x3x16x128xbf16, #tpu.memory_space<vmem>>, %arg10: memref<1x16x128xbf16, #tpu.memory_space<vmem>>, %arg11: memref<1x16x128xbf16, #tpu.memory_space<vmem>>, %arg12: memref<1x2x8x128xf32, #tpu.memory_space<vmem>>, %arg13: memref<2x8x128xf32, #tpu.memory_space<vmem>>) attributes {dimension_semantics = [#tpu.dimension_semantics<parallel>, #tpu.dimension_semantics<arbitrary>], iteration_bounds = array<i64: 4, 1>, scalar_prefetch = 2 : i64, scratch_operands = 1 : i64, tpu.core_type = #tpu.core_type<tc>, window_params = [{transform_indices = @transform_0, window_bounds = array<i64: 192>}, {transform_indices = @transform_1, window_bounds = array<i64: 1, 16, 128>}, {transform_indices = @transform_2, window_bounds = array<i64: 1, 16, 128>}, {pipeline_mode = #tpu.pipeline_mode<synchronous>, transform_indices = @transform_3, window_bounds = array<i64: 2, 16, 128>}, {transform_indices = @transform_4, window_bounds = array<i64: 1, 3, 16, 128>}, {transform_indices = @transform_5, window_bounds = array<i64: 1, 3, 16, 128>}, {transform_indices = @transform_6, window_bounds = array<i64: 1, 16, 128>}, {transform_indices = @transform_7, window_bounds = array<i64: 1, 16, 128>}, {transform_indices = @transform_8, window_bounds = array<i64: 1, 2, 8, 128>}]} {
    %c0_i32 = arith.constant 0 : i32
    %0 = arith.cmpi eq, %arg1, %c0_i32 : i32
    %1 = arith.extui %0 : i1 to i32
    %c0_i32_0 = arith.constant 0 : i32
    %2 = arith.cmpi ne, %1, %c0_i32_0 : i32
    scf.if %2 {
      %cst_53 = arith.constant 0.000000e+00 : f32
      %315 = vector.broadcast %cst_53 : f32 to vector<2x8x128xf32>
      %c0_54 = arith.constant 0 : index
      %c0_55 = arith.constant 0 : index
      %c0_56 = arith.constant 0 : index
      %316 = vector.load %arg13[%c0_54, %c0_55, %c0_56] : memref<2x8x128xf32, #tpu.memory_space<vmem>>, vector<2x8x128xf32>
      tpu.vector_store %arg13[%c0_54, %c0_55, %c0_56], %315 {strides = array<i32>} : memref<2x8x128xf32, #tpu.memory_space<vmem>>, vector<2x8x128xf32>,
    } else {
    }
    %c48_i32 = arith.constant 48 : i32
    %3 = arith.muli %arg0, %c48_i32 : i32
    %c0_i32_1 = arith.constant 0 : i32
    %4 = arith.addi %3, %c0_i32_1 : i32
    %5 = arith.index_cast %4 : i32 to index
    %6 = memref.load %arg4[%5] : memref<192xf32, #tpu.memory_space<smem>>
    %c1_i32 = arith.constant 1 : i32
    %7 = arith.addi %3, %c1_i32 : i32
    %8 = arith.index_cast %7 : i32 to index
    %9 = memref.load %arg4[%8] : memref<192xf32, #tpu.memory_space<smem>>
    %c2_i32 = arith.constant 2 : i32
    %10 = arith.addi %3, %c2_i32 : i32
    %11 = arith.index_cast %10 : i32 to index
    %12 = memref.load %arg4[%11] : memref<192xf32, #tpu.memory_space<smem>>
    %c3_i32 = arith.constant 3 : i32
    %13 = arith.addi %3, %c3_i32 : i32
    %14 = arith.index_cast %13 : i32 to index
    %15 = memref.load %arg4[%14] : memref<192xf32, #tpu.memory_space<smem>>
    %c4_i32 = arith.constant 4 : i32
    %16 = arith.addi %3, %c4_i32 : i32
    %17 = arith.index_cast %16 : i32 to index
    %18 = memref.load %arg4[%17] : memref<192xf32, #tpu.memory_space<smem>>
    %c5_i32 = arith.constant 5 : i32
    %19 = arith.addi %3, %c5_i32 : i32
    %20 = arith.index_cast %19 : i32 to index
    %21 = memref.load %arg4[%20] : memref<192xf32, #tpu.memory_space<smem>>
    %c6_i32 = arith.constant 6 : i32
    %22 = arith.addi %3, %c6_i32 : i32
    %23 = arith.index_cast %22 : i32 to index
    %24 = memref.load %arg4[%23] : memref<192xf32, #tpu.memory_space<smem>>
    %c7_i32 = arith.constant 7 : i32
    %25 = arith.addi %3, %c7_i32 : i32
    %26 = arith.index_cast %25 : i32 to index
    %27 = memref.load %arg4[%26] : memref<192xf32, #tpu.memory_space<smem>>
    %c8_i32 = arith.constant 8 : i32
    %28 = arith.addi %3, %c8_i32 : i32
    %29 = arith.index_cast %28 : i32 to index
    %30 = memref.load %arg4[%29] : memref<192xf32, #tpu.memory_space<smem>>
    %c9_i32 = arith.constant 9 : i32
    %31 = arith.addi %3, %c9_i32 : i32
    %32 = arith.index_cast %31 : i32 to index
    %33 = memref.load %arg4[%32] : memref<192xf32, #tpu.memory_space<smem>>
    %c10_i32 = arith.constant 10 : i32
    %34 = arith.addi %3, %c10_i32 : i32
    %35 = arith.index_cast %34 : i32 to index
    %36 = memref.load %arg4[%35] : memref<192xf32, #tpu.memory_space<smem>>
    %c11_i32 = arith.constant 11 : i32
    %37 = arith.addi %3, %c11_i32 : i32
    %38 = arith.index_cast %37 : i32 to index
    %39 = memref.load %arg4[%38] : memref<192xf32, #tpu.memory_space<smem>>
    %c12_i32 = arith.constant 12 : i32
    %40 = arith.addi %3, %c12_i32 : i32
    %41 = arith.index_cast %40 : i32 to index
    %42 = memref.load %arg4[%41] : memref<192xf32, #tpu.memory_space<smem>>
    %c13_i32 = arith.constant 13 : i32
    %43 = arith.addi %3, %c13_i32 : i32
    %44 = arith.index_cast %43 : i32 to index
    %45 = memref.load %arg4[%44] : memref<192xf32, #tpu.memory_space<smem>>
    %c14_i32 = arith.constant 14 : i32
    %46 = arith.addi %3, %c14_i32 : i32
    %47 = arith.index_cast %46 : i32 to index
    %48 = memref.load %arg4[%47] : memref<192xf32, #tpu.memory_space<smem>>
    %c15_i32 = arith.constant 15 : i32
    %49 = arith.addi %3, %c15_i32 : i32
    %50 = arith.index_cast %49 : i32 to index
    %51 = memref.load %arg4[%50] : memref<192xf32, #tpu.memory_space<smem>>
    %c16_i32 = arith.constant 16 : i32
    %52 = arith.addi %3, %c16_i32 : i32
    %53 = arith.index_cast %52 : i32 to index
    %54 = memref.load %arg4[%53] : memref<192xf32, #tpu.memory_space<smem>>
    %c17_i32 = arith.constant 17 : i32
    %55 = arith.addi %3, %c17_i32 : i32
    %56 = arith.index_cast %55 : i32 to index
    %57 = memref.load %arg4[%56] : memref<192xf32, #tpu.memory_space<smem>>
    %c18_i32 = arith.constant 18 : i32
    %58 = arith.addi %3, %c18_i32 : i32
    %59 = arith.index_cast %58 : i32 to index
    %60 = memref.load %arg4[%59] : memref<192xf32, #tpu.memory_space<smem>>
    %c19_i32 = arith.constant 19 : i32
    %61 = arith.addi %3, %c19_i32 : i32
    %62 = arith.index_cast %61 : i32 to index
    %63 = memref.load %arg4[%62] : memref<192xf32, #tpu.memory_space<smem>>
    %c20_i32 = arith.constant 20 : i32
    %64 = arith.addi %3, %c20_i32 : i32
    %65 = arith.index_cast %64 : i32 to index
    %66 = memref.load %arg4[%65] : memref<192xf32, #tpu.memory_space<smem>>
    %c24_i32 = arith.constant 24 : i32
    %67 = arith.addi %3, %c24_i32 : i32
    %68 = arith.index_cast %67 : i32 to index
    %69 = memref.load %arg4[%68] : memref<192xf32, #tpu.memory_space<smem>>
    %c25_i32 = arith.constant 25 : i32
    %70 = arith.addi %3, %c25_i32 : i32
    %71 = arith.index_cast %70 : i32 to index
    %72 = memref.load %arg4[%71] : memref<192xf32, #tpu.memory_space<smem>>
    %c26_i32 = arith.constant 26 : i32
    %73 = arith.addi %3, %c26_i32 : i32
    %74 = arith.index_cast %73 : i32 to index
    %75 = memref.load %arg4[%74] : memref<192xf32, #tpu.memory_space<smem>>
    %c27_i32 = arith.constant 27 : i32
    %76 = arith.addi %3, %c27_i32 : i32
    %77 = arith.index_cast %76 : i32 to index
    %78 = memref.load %arg4[%77] : memref<192xf32, #tpu.memory_space<smem>>
    %c28_i32 = arith.constant 28 : i32
    %79 = arith.addi %3, %c28_i32 : i32
    %80 = arith.index_cast %79 : i32 to index
    %81 = memref.load %arg4[%80] : memref<192xf32, #tpu.memory_space<smem>>
    %c29_i32 = arith.constant 29 : i32
    %82 = arith.addi %3, %c29_i32 : i32
    %83 = arith.index_cast %82 : i32 to index
    %84 = memref.load %arg4[%83] : memref<192xf32, #tpu.memory_space<smem>>
    %c30_i32 = arith.constant 30 : i32
    %85 = arith.addi %3, %c30_i32 : i32
    %86 = arith.index_cast %85 : i32 to index
    %87 = memref.load %arg4[%86] : memref<192xf32, #tpu.memory_space<smem>>
    %c31_i32 = arith.constant 31 : i32
    %88 = arith.addi %3, %c31_i32 : i32
    %89 = arith.index_cast %88 : i32 to index
    %90 = memref.load %arg4[%89] : memref<192xf32, #tpu.memory_space<smem>>
    %c32_i32 = arith.constant 32 : i32
    %91 = arith.addi %3, %c32_i32 : i32
    %92 = arith.index_cast %91 : i32 to index
    %93 = memref.load %arg4[%92] : memref<192xf32, #tpu.memory_space<smem>>
    %c33_i32 = arith.constant 33 : i32
    %94 = arith.addi %3, %c33_i32 : i32
    %95 = arith.index_cast %94 : i32 to index
    %96 = memref.load %arg4[%95] : memref<192xf32, #tpu.memory_space<smem>>
    %c34_i32 = arith.constant 34 : i32
    %97 = arith.addi %3, %c34_i32 : i32
    %98 = arith.index_cast %97 : i32 to index
    %99 = memref.load %arg4[%98] : memref<192xf32, #tpu.memory_space<smem>>
    %c35_i32 = arith.constant 35 : i32
    %100 = arith.addi %3, %c35_i32 : i32
    %101 = arith.index_cast %100 : i32 to index
    %102 = memref.load %arg4[%101] : memref<192xf32, #tpu.memory_space<smem>>
    %c36_i32 = arith.constant 36 : i32
    %103 = arith.addi %3, %c36_i32 : i32
    %104 = arith.index_cast %103 : i32 to index
    %105 = memref.load %arg4[%104] : memref<192xf32, #tpu.memory_space<smem>>
    %c37_i32 = arith.constant 37 : i32
    %106 = arith.addi %3, %c37_i32 : i32
    %107 = arith.index_cast %106 : i32 to index
    %108 = memref.load %arg4[%107] : memref<192xf32, #tpu.memory_space<smem>>
    %c38_i32 = arith.constant 38 : i32
    %109 = arith.addi %3, %c38_i32 : i32
    %110 = arith.index_cast %109 : i32 to index
    %111 = memref.load %arg4[%110] : memref<192xf32, #tpu.memory_space<smem>>
    %c39_i32 = arith.constant 39 : i32
    %112 = arith.addi %3, %c39_i32 : i32
    %113 = arith.index_cast %112 : i32 to index
    %114 = memref.load %arg4[%113] : memref<192xf32, #tpu.memory_space<smem>>
    %c40_i32 = arith.constant 40 : i32
    %115 = arith.addi %3, %c40_i32 : i32
    %116 = arith.index_cast %115 : i32 to index
    %117 = memref.load %arg4[%116] : memref<192xf32, #tpu.memory_space<smem>>
    %c41_i32 = arith.constant 41 : i32
    %118 = arith.addi %3, %c41_i32 : i32
    %119 = arith.index_cast %118 : i32 to index
    %120 = memref.load %arg4[%119] : memref<192xf32, #tpu.memory_space<smem>>
    %c42_i32 = arith.constant 42 : i32
    %121 = arith.addi %3, %c42_i32 : i32
    %122 = arith.index_cast %121 : i32 to index
    %123 = memref.load %arg4[%122] : memref<192xf32, #tpu.memory_space<smem>>
    %c43_i32 = arith.constant 43 : i32
    %124 = arith.addi %3, %c43_i32 : i32
    %125 = arith.index_cast %124 : i32 to index
    %126 = memref.load %arg4[%125] : memref<192xf32, #tpu.memory_space<smem>>
    %c44_i32 = arith.constant 44 : i32
    %127 = arith.addi %3, %c44_i32 : i32
    %128 = arith.index_cast %127 : i32 to index
    %129 = memref.load %arg4[%128] : memref<192xf32, #tpu.memory_space<smem>>
    %c16_i32_2 = arith.constant 16 : i32
    %130 = arith.muli %arg1, %c16_i32_2 : i32
    %131 = tpu.assume_multiple %130, 16 : i32
    %c0 = arith.constant 0 : index
    %132 = arith.index_cast %131 : i32 to index
    %c0_3 = arith.constant 0 : index
    %133 = vector.load %arg7[%c0, %132, %c0_3] : memref<2x16x128xf32, #tpu.memory_space<vmem>>, vector<1x16x128xf32>
    %134 = vector.shape_cast %133 : vector<1x16x128xf32> to vector<16x128xf32>
    %c1 = arith.constant 1 : index
    %135 = arith.index_cast %131 : i32 to index
    %c0_4 = arith.constant 0 : index
    %136 = vector.load %arg7[%c1, %135, %c0_4] : memref<2x16x128xf32, #tpu.memory_space<vmem>>, vector<1x16x128xf32>
    %137 = vector.shape_cast %136 : vector<1x16x128xf32> to vector<16x128xf32>
    %c0_5 = arith.constant 0 : index
    %138 = arith.index_cast %131 : i32 to index
    %c0_6 = arith.constant 0 : index
    %139 = vector.load %arg5[%c0_5, %138, %c0_6] : memref<1x16x128xf32, #tpu.memory_space<vmem>>, vector<1x16x128xf32>
    %140 = vector.shape_cast %139 : vector<1x16x128xf32> to vector<16x128xf32>
    %141 = math.exp %140 : vector<16x128xf32>
    %c0_7 = arith.constant 0 : index
    %c0_8 = arith.constant 0 : index
    %c0_9 = arith.constant 0 : index
    %c0_10 = arith.constant 0 : index
    %142 = vector.load %arg8[%c0_7, %c0_8, %c0_9, %c0_10] : memref<1x3x16x128xbf16, #tpu.memory_space<vmem>>, vector<1x1x16x128xbf16>
    %143 = vector.shape_cast %142 : vector<1x1x16x128xbf16> to vector<16x128xbf16>
    %144 = arith.extf %143 : vector<16x128xbf16> to vector<16x128xf32>
    %c0_11 = arith.constant 0 : index
    %c1_12 = arith.constant 1 : index
    %c0_13 = arith.constant 0 : index
    %c0_14 = arith.constant 0 : index
    %145 = vector.load %arg8[%c0_11, %c1_12, %c0_13, %c0_14] : memref<1x3x16x128xbf16, #tpu.memory_space<vmem>>, vector<1x1x16x128xbf16>
    %146 = vector.shape_cast %145 : vector<1x1x16x128xbf16> to vector<16x128xbf16>
    %147 = arith.extf %146 : vector<16x128xbf16> to vector<16x128xf32>
    %c0_15 = arith.constant 0 : index
    %c2 = arith.constant 2 : index
    %c0_16 = arith.constant 0 : index
    %c0_17 = arith.constant 0 : index
    %148 = vector.load %arg8[%c0_15, %c2, %c0_16, %c0_17] : memref<1x3x16x128xbf16, #tpu.memory_space<vmem>>, vector<1x1x16x128xbf16>
    %149 = vector.shape_cast %148 : vector<1x1x16x128xbf16> to vector<16x128xbf16>
    %150 = arith.extf %149 : vector<16x128xbf16> to vector<16x128xf32>
    %151 = vector.broadcast %6 : f32 to vector<16x128xf32>
    %152 = arith.mulf %151, %134 : vector<16x128xf32>
    %153 = vector.broadcast %9 : f32 to vector<16x128xf32>
    %154 = arith.mulf %153, %137 : vector<16x128xf32>
    %155 = arith.addf %152, %154 : vector<16x128xf32>
    %156 = vector.broadcast %12 : f32 to vector<16x128xf32>
    %157 = arith.addf %155, %156 : vector<16x128xf32>
    %158 = arith.mulf %141, %157 : vector<16x128xf32>
    %159 = vector.broadcast %33 : f32 to vector<16x128xf32>
    %160 = arith.mulf %159, %144 : vector<16x128xf32>
    %161 = vector.broadcast %36 : f32 to vector<16x128xf32>
    %162 = arith.mulf %161, %147 : vector<16x128xf32>
    %163 = arith.addf %160, %162 : vector<16x128xf32>
    %164 = vector.broadcast %39 : f32 to vector<16x128xf32>
    %165 = arith.mulf %164, %150 : vector<16x128xf32>
    %166 = arith.addf %163, %165 : vector<16x128xf32>
    %167 = arith.subf %158, %166 : vector<16x128xf32>
    %168 = vector.broadcast %60 : f32 to vector<16x128xf32>
    %169 = arith.addf %167, %168 : vector<16x128xf32>
    %170 = arith.mulf %169, %169 : vector<16x128xf32>
    %171 = vector.broadcast %15 : f32 to vector<16x128xf32>
    %172 = arith.mulf %171, %134 : vector<16x128xf32>
    %173 = vector.broadcast %18 : f32 to vector<16x128xf32>
    %174 = arith.mulf %173, %137 : vector<16x128xf32>
    %175 = arith.addf %172, %174 : vector<16x128xf32>
    %176 = vector.broadcast %21 : f32 to vector<16x128xf32>
    %177 = arith.addf %175, %176 : vector<16x128xf32>
    %178 = arith.mulf %141, %177 : vector<16x128xf32>
    %179 = vector.broadcast %42 : f32 to vector<16x128xf32>
    %180 = arith.mulf %179, %144 : vector<16x128xf32>
    %181 = vector.broadcast %45 : f32 to vector<16x128xf32>
    %182 = arith.mulf %181, %147 : vector<16x128xf32>
    %183 = arith.addf %180, %182 : vector<16x128xf32>
    %184 = vector.broadcast %48 : f32 to vector<16x128xf32>
    %185 = arith.mulf %184, %150 : vector<16x128xf32>
    %186 = arith.addf %183, %185 : vector<16x128xf32>
    %187 = arith.subf %178, %186 : vector<16x128xf32>
    %188 = vector.broadcast %63 : f32 to vector<16x128xf32>
    %189 = arith.addf %187, %188 : vector<16x128xf32>
    %190 = arith.mulf %189, %189 : vector<16x128xf32>
    %191 = arith.addf %170, %190 : vector<16x128xf32>
    %192 = vector.broadcast %24 : f32 to vector<16x128xf32>
    %193 = arith.mulf %192, %134 : vector<16x128xf32>
    %194 = vector.broadcast %27 : f32 to vector<16x128xf32>
    %195 = arith.mulf %194, %137 : vector<16x128xf32>
    %196 = arith.addf %193, %195 : vector<16x128xf32>
    %197 = vector.broadcast %30 : f32 to vector<16x128xf32>
    %198 = arith.addf %196, %197 : vector<16x128xf32>
    %199 = arith.mulf %141, %198 : vector<16x128xf32>
    %200 = vector.broadcast %51 : f32 to vector<16x128xf32>
    %201 = arith.mulf %200, %144 : vector<16x128xf32>
    %202 = vector.broadcast %54 : f32 to vector<16x128xf32>
    %203 = arith.mulf %202, %147 : vector<16x128xf32>
    %204 = arith.addf %201, %203 : vector<16x128xf32>
    %205 = vector.broadcast %57 : f32 to vector<16x128xf32>
    %206 = arith.mulf %205, %150 : vector<16x128xf32>
    %207 = arith.addf %204, %206 : vector<16x128xf32>
    %208 = arith.subf %199, %207 : vector<16x128xf32>
    %209 = vector.broadcast %66 : f32 to vector<16x128xf32>
    %210 = arith.addf %208, %209 : vector<16x128xf32>
    %211 = arith.mulf %210, %210 : vector<16x128xf32>
    %212 = arith.addf %191, %211 : vector<16x128xf32>
    %c0_18 = arith.constant 0 : index
    %c0_19 = arith.constant 0 : index
    %c0_20 = arith.constant 0 : index
    %213 = vector.load %arg10[%c0_18, %c0_19, %c0_20] : memref<1x16x128xbf16, #tpu.memory_space<vmem>>, vector<1x16x128xbf16>
    %214 = vector.shape_cast %213 : vector<1x16x128xbf16> to vector<16x128xbf16>
    %215 = arith.extf %214 : vector<16x128xbf16> to vector<16x128xf32>
    %216 = arith.mulf %212, %215 : vector<16x128xf32>
    %c0_21 = arith.constant 0 : index
    %c0_22 = arith.constant 0 : index
    %c0_23 = arith.constant 0 : index
    %217 = vector.load %arg13[%c0_21, %c0_22, %c0_23] : memref<2x8x128xf32, #tpu.memory_space<vmem>>, vector<1x8x128xf32>
    %218 = vector.shape_cast %217 : vector<1x8x128xf32> to vector<8x128xf32>
    %219 = vector.shape_cast %216 : vector<16x128xf32> to vector<2x8x128xf32>
    %cst = arith.constant dense<0.000000e+00> : vector<8x128xf32>
    %220 = vector.multi_reduction <add>, %219, %cst [0] : vector<2x8x128xf32> to vector<8x128xf32>
    %221 = arith.addf %218, %220 : vector<8x128xf32>
    %c0_24 = arith.constant 0 : index
    %c0_25 = arith.constant 0 : index
    %c0_26 = arith.constant 0 : index
    %222 = vector.load %arg13[%c0_24, %c0_25, %c0_26] : memref<2x8x128xf32, #tpu.memory_space<vmem>>, vector<1x8x128xf32>
    %223 = vector.shape_cast %222 : vector<1x8x128xf32> to vector<8x128xf32>
    %224 = vector.shape_cast %221 : vector<8x128xf32> to vector<1x8x128xf32>
    tpu.vector_store %arg13[%c0_24, %c0_25, %c0_26], %224 {strides = array<i32>} : memref<2x8x128xf32, #tpu.memory_space<vmem>>, vector<1x8x128xf32>,
    %c0_27 = arith.constant 0 : index
    %225 = arith.index_cast %131 : i32 to index
    %c0_28 = arith.constant 0 : index
    %226 = vector.load %arg6[%c0_27, %225, %c0_28] : memref<1x16x128xf32, #tpu.memory_space<vmem>>, vector<1x16x128xf32>
    %227 = vector.shape_cast %226 : vector<1x16x128xf32> to vector<16x128xf32>
    %228 = math.exp %227 : vector<16x128xf32>
    %c0_29 = arith.constant 0 : index
    %c0_30 = arith.constant 0 : index
    %c0_31 = arith.constant 0 : index
    %c0_32 = arith.constant 0 : index
    %229 = vector.load %arg9[%c0_29, %c0_30, %c0_31, %c0_32] : memref<1x3x16x128xbf16, #tpu.memory_space<vmem>>, vector<1x1x16x128xbf16>
    %230 = vector.shape_cast %229 : vector<1x1x16x128xbf16> to vector<16x128xbf16>
    %231 = arith.extf %230 : vector<16x128xbf16> to vector<16x128xf32>
    %c0_33 = arith.constant 0 : index
    %c1_34 = arith.constant 1 : index
    %c0_35 = arith.constant 0 : index
    %c0_36 = arith.constant 0 : index
    %232 = vector.load %arg9[%c0_33, %c1_34, %c0_35, %c0_36] : memref<1x3x16x128xbf16, #tpu.memory_space<vmem>>, vector<1x1x16x128xbf16>
    %233 = vector.shape_cast %232 : vector<1x1x16x128xbf16> to vector<16x128xbf16>
    %234 = arith.extf %233 : vector<16x128xbf16> to vector<16x128xf32>
    %c0_37 = arith.constant 0 : index
    %c2_38 = arith.constant 2 : index
    %c0_39 = arith.constant 0 : index
    %c0_40 = arith.constant 0 : index
    %235 = vector.load %arg9[%c0_37, %c2_38, %c0_39, %c0_40] : memref<1x3x16x128xbf16, #tpu.memory_space<vmem>>, vector<1x1x16x128xbf16>
    %236 = vector.shape_cast %235 : vector<1x1x16x128xbf16> to vector<16x128xbf16>
    %237 = arith.extf %236 : vector<16x128xbf16> to vector<16x128xf32>
    %238 = vector.broadcast %69 : f32 to vector<16x128xf32>
    %239 = arith.mulf %238, %134 : vector<16x128xf32>
    %240 = vector.broadcast %72 : f32 to vector<16x128xf32>
    %241 = arith.mulf %240, %137 : vector<16x128xf32>
    %242 = arith.addf %239, %241 : vector<16x128xf32>
    %243 = vector.broadcast %75 : f32 to vector<16x128xf32>
    %244 = arith.addf %242, %243 : vector<16x128xf32>
    %245 = arith.mulf %228, %244 : vector<16x128xf32>
    %246 = vector.broadcast %96 : f32 to vector<16x128xf32>
    %247 = arith.mulf %246, %231 : vector<16x128xf32>
    %248 = vector.broadcast %99 : f32 to vector<16x128xf32>
    %249 = arith.mulf %248, %234 : vector<16x128xf32>
    %250 = arith.addf %247, %249 : vector<16x128xf32>
    %251 = vector.broadcast %102 : f32 to vector<16x128xf32>
    %252 = arith.mulf %251, %237 : vector<16x128xf32>
    %253 = arith.addf %250, %252 : vector<16x128xf32>
    %254 = arith.subf %245, %253 : vector<16x128xf32>
    %255 = vector.broadcast %123 : f32 to vector<16x128xf32>
    %256 = arith.addf %254, %255 : vector<16x128xf32>
    %257 = arith.mulf %256, %256 : vector<16x128xf32>
    %258 = vector.broadcast %78 : f32 to vector<16x128xf32>
    %259 = arith.mulf %258, %134 : vector<16x128xf32>
    %260 = vector.broadcast %81 : f32 to vector<16x128xf32>
    %261 = arith.mulf %260, %137 : vector<16x128xf32>
    %262 = arith.addf %259, %261 : vector<16x128xf32>
    %263 = vector.broadcast %84 : f32 to vector<16x128xf32>
    %264 = arith.addf %262, %263 : vector<16x128xf32>
    %265 = arith.mulf %228, %264 : vector<16x128xf32>
    %266 = vector.broadcast %105 : f32 to vector<16x128xf32>
    %267 = arith.mulf %266, %231 : vector<16x128xf32>
    %268 = vector.broadcast %108 : f32 to vector<16x128xf32>
    %269 = arith.mulf %268, %234 : vector<16x128xf32>
    %270 = arith.addf %267, %269 : vector<16x128xf32>
    %271 = vector.broadcast %111 : f32 to vector<16x128xf32>
    %272 = arith.mulf %271, %237 : vector<16x128xf32>
    %273 = arith.addf %270, %272 : vector<16x128xf32>
    %274 = arith.subf %265, %273 : vector<16x128xf32>
    %275 = vector.broadcast %126 : f32 to vector<16x128xf32>
    %276 = arith.addf %274, %275 : vector<16x128xf32>
    %277 = arith.mulf %276, %276 : vector<16x128xf32>
    %278 = arith.addf %257, %277 : vector<16x128xf32>
    %279 = vector.broadcast %87 : f32 to vector<16x128xf32>
    %280 = arith.mulf %279, %134 : vector<16x128xf32>
    %281 = vector.broadcast %90 : f32 to vector<16x128xf32>
    %282 = arith.mulf %281, %137 : vector<16x128xf32>
    %283 = arith.addf %280, %282 : vector<16x128xf32>
    %284 = vector.broadcast %93 : f32 to vector<16x128xf32>
    %285 = arith.addf %283, %284 : vector<16x128xf32>
    %286 = arith.mulf %228, %285 : vector<16x128xf32>
    %287 = vector.broadcast %114 : f32 to vector<16x128xf32>
    %288 = arith.mulf %287, %231 : vector<16x128xf32>
    %289 = vector.broadcast %117 : f32 to vector<16x128xf32>
    %290 = arith.mulf %289, %234 : vector<16x128xf32>
    %291 = arith.addf %288, %290 : vector<16x128xf32>
    %292 = vector.broadcast %120 : f32 to vector<16x128xf32>
    %293 = arith.mulf %292, %237 : vector<16x128xf32>
    %294 = arith.addf %291, %293 : vector<16x128xf32>
    %295 = arith.subf %286, %294 : vector<16x128xf32>
    %296 = vector.broadcast %129 : f32 to vector<16x128xf32>
    %297 = arith.addf %295, %296 : vector<16x128xf32>
    %298 = arith.mulf %297, %297 : vector<16x128xf32>
    %299 = arith.addf %278, %298 : vector<16x128xf32>
    %c0_41 = arith.constant 0 : index
    %c0_42 = arith.constant 0 : index
    %c0_43 = arith.constant 0 : index
    %300 = vector.load %arg11[%c0_41, %c0_42, %c0_43] : memref<1x16x128xbf16, #tpu.memory_space<vmem>>, vector<1x16x128xbf16>
    %301 = vector.shape_cast %300 : vector<1x16x128xbf16> to vector<16x128xbf16>
    %302 = arith.extf %301 : vector<16x128xbf16> to vector<16x128xf32>
    %303 = arith.mulf %299, %302 : vector<16x128xf32>
    %c1_44 = arith.constant 1 : index
    %c0_45 = arith.constant 0 : index
    %c0_46 = arith.constant 0 : index
    %304 = vector.load %arg13[%c1_44, %c0_45, %c0_46] : memref<2x8x128xf32, #tpu.memory_space<vmem>>, vector<1x8x128xf32>
    %305 = vector.shape_cast %304 : vector<1x8x128xf32> to vector<8x128xf32>
    %306 = vector.shape_cast %303 : vector<16x128xf32> to vector<2x8x128xf32>
    %cst_47 = arith.constant dense<0.000000e+00> : vector<8x128xf32>
    %307 = vector.multi_reduction <add>, %306, %cst_47 [0] : vector<2x8x128xf32> to vector<8x128xf32>
    %308 = arith.addf %305, %307 : vector<8x128xf32>
    %c1_48 = arith.constant 1 : index
    %c0_49 = arith.constant 0 : index
    %c0_50 = arith.constant 0 : index
    %309 = vector.load %arg13[%c1_48, %c0_49, %c0_50] : memref<2x8x128xf32, #tpu.memory_space<vmem>>, vector<1x8x128xf32>
    %310 = vector.shape_cast %309 : vector<1x8x128xf32> to vector<8x128xf32>
    %311 = vector.shape_cast %308 : vector<8x128xf32> to vector<1x8x128xf32>
    tpu.vector_store %arg13[%c1_48, %c0_49, %c0_50], %311 {strides = array<i32>} : memref<2x8x128xf32, #tpu.memory_space<vmem>>, vector<1x8x128xf32>,
    %c0_i32_51 = arith.constant 0 : i32
    %312 = arith.cmpi eq, %arg1, %c0_i32_51 : i32
    %313 = arith.extui %312 : i1 to i32
    %c0_i32_52 = arith.constant 0 : i32
    %314 = arith.cmpi ne, %313, %c0_i32_52 : i32
    scf.if %314 {
      %c0_53 = arith.constant 0 : index
      %c0_54 = arith.constant 0 : index
      %c0_55 = arith.constant 0 : index
      %315 = vector.load %arg13[%c0_53, %c0_54, %c0_55] : memref<2x8x128xf32, #tpu.memory_space<vmem>>, vector<2x8x128xf32>
      %c0_56 = arith.constant 0 : index
      %c0_57 = arith.constant 0 : index
      %c0_58 = arith.constant 0 : index
      %c0_59 = arith.constant 0 : index
      %316 = vector.load %arg12[%c0_56, %c0_57, %c0_58, %c0_59] : memref<1x2x8x128xf32, #tpu.memory_space<vmem>>, vector<1x2x8x128xf32>
      %317 = vector.shape_cast %316 : vector<1x2x8x128xf32> to vector<2x8x128xf32>
      %318 = vector.shape_cast %315 : vector<2x8x128xf32> to vector<1x2x8x128xf32>
      tpu.vector_store %arg12[%c0_56, %c0_57, %c0_58, %c0_59], %318 {strides = array<i32>} : memref<1x2x8x128xf32, #tpu.memory_space<vmem>>, vector<1x2x8x128xf32>,
    } else {
    }
    return
  }
  func.func @transform_0(%arg0: i32, %arg1: i32, %arg2: memref<4xi32, #tpu.memory_space<smem>>, %arg3: memref<4xi32, #tpu.memory_space<smem>>) -> i32 {
    %c0_i32 = arith.constant 0 : i32
    %c0_i32_0 = arith.constant 0 : i32
    return %c0_i32 : i32
  }
  func.func @transform_1(%arg0: i32, %arg1: i32, %arg2: memref<4xi32, #tpu.memory_space<smem>>, %arg3: memref<4xi32, #tpu.memory_space<smem>>) -> (i32, i32, i32) {
    %0 = arith.index_cast %arg0 : i32 to index
    %1 = memref.load %arg2[%0] : memref<4xi32, #tpu.memory_space<smem>>
    %c0_i32 = arith.constant 0 : i32
    %c0_i32_0 = arith.constant 0 : i32
    %c0_i32_1 = arith.constant 0 : i32
    return %1, %c0_i32, %c0_i32_0 : i32, i32, i32
  }
  func.func @transform_2(%arg0: i32, %arg1: i32, %arg2: memref<4xi32, #tpu.memory_space<smem>>, %arg3: memref<4xi32, #tpu.memory_space<smem>>) -> (i32, i32, i32) {
    %0 = arith.index_cast %arg0 : i32 to index
    %1 = memref.load %arg3[%0] : memref<4xi32, #tpu.memory_space<smem>>
    %c0_i32 = arith.constant 0 : i32
    %c0_i32_0 = arith.constant 0 : i32
    %c0_i32_1 = arith.constant 0 : i32
    return %1, %c0_i32, %c0_i32_0 : i32, i32, i32
  }
  func.func @transform_3(%arg0: i32, %arg1: i32, %arg2: memref<4xi32, #tpu.memory_space<smem>>, %arg3: memref<4xi32, #tpu.memory_space<smem>>) -> (i32, i32, i32) {
    %c0_i32 = arith.constant 0 : i32
    %c0_i32_0 = arith.constant 0 : i32
    %c0_i32_1 = arith.constant 0 : i32
    %c0_i32_2 = arith.constant 0 : i32
    return %c0_i32, %c0_i32_0, %c0_i32_1 : i32, i32, i32
  }
  func.func @transform_4(%arg0: i32, %arg1: i32, %arg2: memref<4xi32, #tpu.memory_space<smem>>, %arg3: memref<4xi32, #tpu.memory_space<smem>>) -> (i32, i32, i32, i32) {
    %c0_i32 = arith.constant 0 : i32
    %c0_i32_0 = arith.constant 0 : i32
    %c0_i32_1 = arith.constant 0 : i32
    return %arg0, %c0_i32, %arg1, %c0_i32_0 : i32, i32, i32, i32
  }
  func.func @transform_5(%arg0: i32, %arg1: i32, %arg2: memref<4xi32, #tpu.memory_space<smem>>, %arg3: memref<4xi32, #tpu.memory_space<smem>>) -> (i32, i32, i32, i32) {
    %c0_i32 = arith.constant 0 : i32
    %c0_i32_0 = arith.constant 0 : i32
    %c0_i32_1 = arith.constant 0 : i32
    return %arg0, %c0_i32, %arg1, %c0_i32_0 : i32, i32, i32, i32
  }
  func.func @transform_6(%arg0: i32, %arg1: i32, %arg2: memref<4xi32, #tpu.memory_space<smem>>, %arg3: memref<4xi32, #tpu.memory_space<smem>>) -> (i32, i32, i32) {
    %c0_i32 = arith.constant 0 : i32
    %c0_i32_0 = arith.constant 0 : i32
    return %arg0, %arg1, %c0_i32 : i32, i32, i32
  }
  func.func @transform_7(%arg0: i32, %arg1: i32, %arg2: memref<4xi32, #tpu.memory_space<smem>>, %arg3: memref<4xi32, #tpu.memory_space<smem>>) -> (i32, i32, i32) {
    %c0_i32 = arith.constant 0 : i32
    %c0_i32_0 = arith.constant 0 : i32
    return %arg0, %arg1, %c0_i32 : i32, i32, i32
  }
  func.func @transform_8(%arg0: i32, %arg1: i32, %arg2: memref<4xi32, #tpu.memory_space<smem>>, %arg3: memref<4xi32, #tpu.memory_space<smem>>) -> (i32, i32, i32, i32) {
    %c0_i32 = arith.constant 0 : i32
    %c0_i32_0 = arith.constant 0 : i32
    %c0_i32_1 = arith.constant 0 : i32
    %c0_i32_2 = arith.constant 0 : i32
    return %arg0, %c0_i32, %c0_i32_0, %c0_i32_1 : i32, i32, i32, i32
  }
}

</mosaic_0001>

<bundles_post_ra>
// kernel: _lambda_.1
= control target key start
LH: loop header
LB: loop body
LE: loop exit
PB: predicated region body
PF: predicated region fallthrough
CT: control target
= control target key end

     0   :  { %s1255_s19 = smov [#allocation4]   ;;  %s1256_s20 = smov [#allocation5]   ;;  %s1719_s0 = inlined_call_operand.vmem [shape: s32[4], index: 0, kind: input, shape index: {}]   ;;  %s1720_s2 = inlined_call_operand.vmem [shape: f32[192], index: 2, kind: input, shape index: {}]   ;;  %s1721_s3 = inlined_call_operand.vmem [shape: f32[3,16,128], index: 3, kind: input, shape index: {}, may-alias: {3,4}]   ;;  %s1722_s4 = inlined_call_operand.vmem [shape: f32[3,16,128], index: 4, kind: input, shape index: {}, may-alias: {3,4}]   ;;  %s1723_s5 = inlined_call_operand.vmem [shape: f32[2,16,128], index: 5, kind: input, shape index: {}]   ;;  %s1724_s6 = inlined_call_operand.vmem [shape: bf16[4,3,16,128], index: 6, kind: input, shape index: {}]   ;;  %s1725_s7 = inlined_call_operand.vmem [shape: bf16[4,3,16,128], index: 7, kind: input, shape index: {}]   ;;  %s1726_s8 = inlined_call_operand.vmem [shape: bf16[4,16,128], index: 8, kind: input, shape index: {}]   ;;  %s1727_s9 = inlined_call_operand.vmem [shape: bf16[4,16,128], index: 9, kind: input, shape index: {}]   ;;  %s1728_s10 = inlined_call_operand.vmem [shape: f32[4,2,8,128], index: 10, kind: output, shape index: {}]   ;;  %s1729_s1 = inlined_call_operand.vmem [shape: s32[4], index: 1, kind: input, shape index: {}]  }
   0x1   :  { %1732 = sst [smem:[#allocation10_spill]] %s1720_s2  ;;  %s16_s15 = sshll.u32 %s1719_s0, 4  ;;  %s17_s15 = int_to_ptr.vmem [resolvable:$true] %s16_s15 }
   0x2   :  { %1733 = sst [smem:[#allocation11_spill]] %s1721_s3  ;;  %s21_s18 = sshll.u32 %s1729_s1, 4  ;;  %s22_s18 = int_to_ptr.vmem [resolvable:$true] %s21_s18 }
   0x3   :  { %19 = dma.vmem_to_smem %s17_s15, 16, %s1255_s19, [#allocation3] }
   0x4   :  { %24 = dma.vmem_to_smem %s22_s18, 16, %s1256_s20, [#allocation3] }
   0x5   :  { %1237 = dma.done.wait [#allocation3], 32 }
   0x6   :  { %1238 = vsyncadd [#allocation3], 4294967264 }
   0x7   :  { %27 = sfence }
   0x8   :  { %28 = vsyncpa [#allocation7], 0  ;;  %s1319_s21 = smov 0   ;;  %s1321_s22 = smov 0  }
   0x9   :  { %s1323_s23 = smov 0  }
   0xa LB: > { %s1068_s0 = sadd.s32 4294967295, %s1253_s23   ;;  %s46_s1 = sadd.s32 1, %s1249_s22  ;;  %s1253_s23 = sphi %s1323_s23, %s34_s23   ;;  %s1249_s22 = sphi %s1321_s22, %s1739_s22   ;;  %s1245_s21 = sphi %s1319_s21, %s1738_s21  }
   0xb   : > { %p48_p0 = scmp.ge.s32.totalorder %s46_s1, 4  ;;  %p1070_p1 = scmp.ge.s32.totalorder %s1253_s23, 1 }
   0xc   : > { %p287_p2 = scmp.lt.s32.totalorder %s1253_s23, 5  ;;  %p1149_p4 = scmp.eq.s32.totalorder %s1068_s0, 0 }
   0xd   : > { %s1741_s1 = smov (%p48_p0, %s46_s1), 0  ;;  %s1734_s2 = sld [smem:[#allocation10_spill]] }
   0xe   : > { %p288_p3 = pnand %p1070_p1, %p287_p2  ;;  %s1257_s27 = smov [#allocation6]  }
  0x10   : > { %p1145_p5 = pneg %p288_p3  ;;  %387 = sbr.rel (%p288_p3) target bundleno = 107 (0x6b), region = 52 }
  0x12   : > { %p1146_p6 = pnand %p1149_p4, %p1145_p5 }
  0x13   : > { %s299_s26 = sshll.u32 %s1734_s2, 4  ;;  %s300_s26 = int_to_ptr.vmem [resolvable:$true] %s299_s26 }
  0x14   : > { %1148 = dma.vmem_to_smem (!%p1146_p6), %s300_s26, 32, %s1257_s27, [#allocation7]  }
  0x15   : > { %1240 = dma.done.wait (%p1149_p4), [#allocation7], 32  }
  0x16   : > { %1242 = vsyncadd (%p1149_p4), [#allocation7], 4294967264 }
  0x17   : > { %394 = sfence }
  0x18   : > { %s466_s28 = sld [smem:[#allocation4 + %s1245_s21]]  ;;  %p481_p7 = scmp.lt.s32.totalorder %s1245_s21, 3  ;;  %v1389_v5 = vld [vmem:[%s1723_s5] sm:$0xff]  ;;  %v1394_v6 = vld [vmem:[%s1723_s5 + $0x8] sm:$0xff]  ;;  %v1399_v7 = vld [vmem:[%s1723_s5 + $0x10] sm:$0xff] }
  0x19   : > { %s473_s29 = sld [smem:[#allocation5 + %s1245_s21]]  ;;  %s1341_s30 = smul.u32 48, %s1245_s21  ;;  %v1409_v10 = vld [vmem:[%s1723_s5 + $0x18] sm:$0xff] }
  0x1a   : > { %s1743_s21 = smov (!%p481_p7, %s1245_s21), 3  ;;  %s1735_s3 = sld [smem:[#allocation11_spill]] }
  0x1b   : > { %s1346_s11 = sld [smem:[#allocation6 + %s1341_s30]]  ;;  %s1730_s12 = smul.u32 24, %s1743_s21 }
  0x1c   : > { %s533_s14 = sadd.s32 1, %s1341_s30  ;;  %s537_s16 = sadd.s32 3, %s1341_s30 }
  0x1d   : > { %s1355_s18 = scalar_lea.vmem %s1724_s6, %s1730_s12  ;;  %s1365_s27 = sld [smem:[#allocation6 + %s533_s14]] }
  0x1e   : > { %p467_p8 = scmp.lt.s32.totalorder %s466_s28, 2  ;;  %s1371_s17 = sld [smem:[#allocation6 + %s537_s16]]  ;;  %v1105_v11 = vld [vmem:[%s1355_s18] sm:$0xff]   ;;  %v1136_v12 = vld [vmem:[%s1355_s18 + $0x8] sm:$0xff]   ;;  %v1137_v20 = vld [vmem:[%s1355_s18 + $0x10] sm:$0xff]  }
  0x1f   : > { %p474_p9 = scmp.lt.s32.totalorder %s473_s29, 2  ;;  %s539_s12 = sadd.s32 4, %s1341_s30  ;;  %v1419_v16 = vunpack.c.l.bf16 %v1105_v11  ;;  %v1421_v17 = vunpack.c.h.bf16 %v1105_v11  ;;  %v1423_v18 = vunpack.c.l.bf16 %v1136_v12  ;;  %v1425_v19 = vunpack.c.h.bf16 %v1136_v12 }
  0x20   : > { %s1745_s28 = smov (!%p467_p8, %s466_s28), 2  ;;  %s1374_s2 = sld [smem:[#allocation6 + %s539_s12]]  ;;  %v1431_v21 = vunpack.c.l.bf16 %v1137_v20  ;;  %v1433_v22 = vunpack.c.h.bf16 %v1137_v20 }
  0x21   : > { %s1747_s29 = smov (!%p474_p9, %s473_s29), 2  ;;  %s1099_s13 = sshll.u32 %s1745_s28, 4  ;;  %v644_v8 = vstv %s1346_s11 }
  0x22   : > { %s1100_s15 = sshll.u32 %s1747_s29, 4  ;;  %s471_s0 = scalar_lea.vmem %s1735_s3, %s1099_s13  ;;  %v645_v13 = vmul.f32 %v644_v8, %v1389_v5  ;;  %v646_v14 = vmul.f32 %v644_v8, %v1394_v6 }
  0x23   : > { %s1363_s26 = scalar_lea.vmem %s1722_s4, %s1100_s15  ;;  %s535_s28 = sadd.s32 2, %s1341_s30  ;;  %v624_v0 = vld [vmem:[%s471_s0] sm:$0xff]  ;;  %v625_v1 = vld [vmem:[%s471_s0 + $0x8] sm:$0xff]  ;;  %v647_v15 = vstv %s1365_s27 }
  0x24   : > { %s1368_s29 = sld [smem:[#allocation6 + %s535_s28]]  ;;  %s541_s13 = sadd.s32 5, %s1341_s30  ;;  %v758_v2 = vld [vmem:[%s1363_s26] sm:$0xff]  ;;  %v626_v3 = vmul.f32 1.442695, %v624_v0  ;;  %v648_v23 = vmul.f32 %v1399_v7, %v647_v15  ;;  %v649_v24 = vmul.f32 %v1409_v10, %v647_v15  ;;  %v677_v26 = vstv %s1371_s17 }
  0x25   : > { %s1378_s15 = sld [smem:[#allocation6 + %s541_s13]]  ;;  %s543_s14 = sadd.s32 6, %s1341_s30  ;;  %v628_v4 = vmul.f32 1.442695, %v625_v1  ;;  %v1402_v9 = vmul.f32 1.442695, %v758_v2  ;;  %v678_v31 = vmul.f32 %v677_v26, %v1389_v5  ;;  %v679_v32 = vmul.f32 %v677_v26, %v1394_v6 }
  0x26   : > { %s1381_s19 = sld [smem:[#allocation6 + %s543_s14]]  ;;  %s545_s20 = sadd.s32 7, %s1341_s30  ;;  %1178 = vpow2.f32 %v626_v3  ;;  %v680_v27 = vstv %s1374_s2  ;;  %v650_v29 = vadd.f32 %v648_v23, %v645_v13  ;;  %v651_v30 = vadd.f32 %v649_v24, %v646_v14 }
  0x27   : > { %s1384_s12 = sld [smem:[#allocation6 + %s545_s20]]  ;;  %s547_s14 = sadd.s32 8, %s1341_s30  ;;  %1180 = vpow2.f32 %v628_v4  ;;  %v681_v34 = vmul.f32 %v1399_v7, %v680_v27  ;;  %v682_v35 = vmul.f32 %v1409_v10, %v680_v27 }
  0x28   : > { %s549_s20 = sadd.s32 9, %s1341_s30  ;;  %s551_s0 = sadd.s32 10, %s1341_s30  ;;  %1182 = vpow2.f32 %v1402_v9 }
  0x29   : > { %s1416_s11 = sld [smem:[#allocation6 + %s549_s20]]  ;;  %s553_s27 = sadd.s32 11, %s1341_s30  ;;  %v683_v44 = vadd.f32 %v681_v34, %v678_v31  ;;  %v684_v45 = vadd.f32 %v682_v35, %v679_v32 }
  0x2a   : > { %s1428_s28 = sld [smem:[#allocation6 + %s551_s0]]  ;;  %s555_s13 = sadd.s32 12, %s1341_s30  ;;  %v652_v25 = vstv %s1368_s29 }
  0x2b   : > { %s1437_s16 = sld [smem:[#allocation6 + %s553_s27]]  ;;  %v685_v28 = vstv %s1378_s15  ;;  %s557_s20 = sadd.s32 13, %s1341_s30  ;;  %v653_v39 = vadd.f32 %v652_v25, %v650_v29  ;;  %v654_v40 = vadd.f32 %v652_v25, %v651_v30 }
  0x2c   : > { %s1444_s18 = sld [smem:[#allocation6 + %s555_s13]]  ;;  %v1449_v33 = vpop.eup %1178  ;;  %s559_s29 = sadd.s32 14, %s1341_s30  ;;  %v712_v36 = vstv %s1381_s19  ;;  %v686_v53 = vadd.f32 %v685_v28, %v683_v44  ;;  %v687_v54 = vadd.f32 %v685_v28, %v684_v45 }
  0x2d   : > { %s1451_s24 = sld [smem:[#allocation6 + %s557_s20]]  ;;  %v715_v37 = vstv %s1384_s12  ;;  %v1458_v38 = vpop.eup %1180  ;;  %s561_s17 = sadd.s32 15, %s1341_s30  ;;  %v713_v41 = vmul.f32 %v712_v36, %v1389_v5  ;;  %v714_v42 = vmul.f32 %v712_v36, %v1394_v6  ;;  %v655_v47 = vmul.f32 %v1449_v33, %v653_v39 }
  0x2e   : > { %s1460_s2 = sld [smem:[#allocation6 + %s559_s29]]  ;;  %v716_v46 = vmul.f32 %v1399_v7, %v715_v37  ;;  %s563_s12 = sadd.s32 16, %s1341_s30  ;;  %v656_v48 = vmul.f32 %v1458_v38, %v654_v40  ;;  %v688_v59 = vmul.f32 %v1449_v33, %v686_v53  ;;  %v689_v60 = vmul.f32 %v1458_v38, %v687_v54  ;;  %v759_v53 = vld [vmem:[%s1363_s26 + $0x8] sm:$0xff] }
  0x2f   : > { %s1467_s15 = sld [smem:[#allocation6 + %s547_s14]]  ;;  %v657_v43 = vstv %s1416_s11  ;;  %s565_s14 = sadd.s32 17, %s1341_s30  ;;  %v717_v11 = vmul.f32 %v1409_v10, %v715_v37 }
  0x30   : > { %s1471_s19 = sld [smem:[#allocation6 + %s561_s17]]  ;;  %v658_v49 = vmul.f32 %v1419_v16, %v657_v43  ;;  %v659_v50 = vmul.f32 %v1421_v17, %v657_v43  ;;  %s567_s25 = sadd.s32 18, %s1341_s30  ;;  %v660_v51 = vstv %s1428_s28  ;;  %v718_v24 = vadd.f32 %v716_v46, %v713_v41 }
  0x31   : > { %v665_v52 = vstv %s1437_s16  ;;  %s1482_s11 = sld [smem:[#allocation6 + %s567_s25]]  ;;  %s569_s0 = sadd.s32 19, %s1341_s30  ;;  %v661_v55 = vmul.f32 %v1423_v18, %v660_v51  ;;  %v662_v56 = vmul.f32 %v1425_v19, %v660_v51  ;;  %v719_v25 = vadd.f32 %v717_v11, %v714_v42 }
  0x32   : > { %v666_v57 = vmul.f32 %v1431_v21, %v665_v52  ;;  %v667_v58 = vmul.f32 %v1433_v22, %v665_v52  ;;  %s1489_s27 = sld [smem:[#allocation6 + %s569_s0]]  ;;  %v690_v61 = vstv %s1444_s18  ;;  %s571_s16 = sadd.s32 20, %s1341_s30 }
  0x33   : > { %v693_v62 = vstv %s1451_s24  ;;  %s1495_s28 = sld [smem:[#allocation6 + %s563_s12]]  ;;  %v663_v63 = vadd.f32 %v661_v55, %v658_v49  ;;  %v664_v0 = vadd.f32 %v662_v56, %v659_v50  ;;  %v691_v1 = vmul.f32 %v1419_v16, %v690_v61  ;;  %s1731_s18 = sshll.u32 %s1743_s21, 3 }
  0x34   : > { %v692_v2 = vmul.f32 %v1421_v17, %v690_v61  ;;  %s1500_s13 = sld [smem:[#allocation6 + %s565_s14]]  ;;  %v694_v3 = vmul.f32 %v1423_v18, %v693_v62  ;;  %v695_v4 = vmul.f32 %v1425_v19, %v693_v62  ;;  %v698_v8 = vstv %s1460_s2  ;;  %s573_s24 = sadd.s32 24, %s1341_s30 }
  0x35   : > { %v668_v12 = vadd.f32 %v666_v57, %v663_v63  ;;  %v669_v13 = vadd.f32 %v667_v58, %v664_v0  ;;  %v699_v14 = vmul.f32 %v1431_v21, %v698_v8  ;;  %v700_v15 = vmul.f32 %v1433_v22, %v698_v8  ;;  %s1509_s20 = sld [smem:[#allocation6 + %s571_s16]]  ;;  %s575_s29 = sadd.s32 25, %s1341_s30 }
  0x36   : > { %v696_v20 = vadd.f32 %v694_v3, %v691_v1  ;;  %v697_v23 = vadd.f32 %v695_v4, %v692_v2  ;;  %v720_v29 = vstv %s1467_s15  ;;  %s508_s12 = scalar_lea.vmem %s1726_s8, %s1731_s18  ;;  %s577_s14 = sadd.s32 26, %s1341_s30  ;;  %v725_v39 = vstv %s1471_s19 }
  0x37   : > { %v670_v26 = vsub.f32 %v655_v47, %v668_v12  ;;  %v671_v27 = vsub.f32 %v656_v48, %v669_v13  ;;  %v672_v28 = vstv %s1482_s11  ;;  %v721_v34 = vadd.f32 %v720_v29, %v718_v24  ;;  %s1522_s25 = sld [smem:[#allocation6 + %s573_s24]]  ;;  %s1736_s11 = smul.u32 24, %s1743_s21  ;;  %v1544_v48 = vld [vmem:[%s508_s12] sm:$0xff]  }
  0x38   : > { %v701_v30 = vadd.f32 %v699_v14, %v696_v20  ;;  %v702_v31 = vadd.f32 %v700_v15, %v697_v23  ;;  %v705_v32 = vstv %s1489_s27  ;;  %v722_v37 = vadd.f32 %v720_v29, %v719_v25  ;;  %s1532_s2 = sld [smem:[#allocation6 + %s575_s29]]  ;;  %s579_s19 = sadd.s32 27, %s1341_s30  ;;  %v1605_v25 = vpop.eup %1182 }
  0x39   : > { %v673_v35 = vadd.f32 %v672_v28, %v670_v26  ;;  %v674_v36 = vadd.f32 %v672_v28, %v671_v27  ;;  %s1530_s16 = scalar_lea.vmem %s1725_s7, %s1736_s11  ;;  %v1535_v42 = vmul.f32 %v1449_v33, %v721_v34  ;;  %v726_v43 = vmul.f32 %v1419_v16, %v725_v39  ;;  %s1538_s27 = sld [smem:[#allocation6 + %s577_s14]] }
  0x3a   : > { %v703_v40 = vsub.f32 %v688_v59, %v701_v30  ;;  %v704_v41 = vsub.f32 %v689_v60, %v702_v31  ;;  %v1541_v46 = vmul.f32 %v1458_v38, %v722_v37  ;;  %v727_v47 = vmul.f32 %v1421_v17, %v725_v39  ;;  %s591_s24 = sadd.s32 33, %s1341_s30  ;;  %s593_s17 = sadd.s32 34, %s1341_s30  ;;  %v1121_v54 = vld [vmem:[%s1530_s16] sm:$0xff]   ;;  %v1138_v58 = vld [vmem:[%s1530_s16 + $0x8] sm:$0xff]   ;;  %v1139_v59 = vld [vmem:[%s1530_s16 + $0x10] sm:$0xff]  }
  0x3b   : > { %v675_v44 = vmul.f32 %v673_v35, %v673_v35  ;;  %v676_v45 = vmul.f32 %v674_v36, %v674_v36  ;;  %v728_v16 = vstv %s1495_s28  ;;  %v733_v50 = vstv %s1500_s13  ;;  %s1550_s29 = sld [smem:[#allocation6 + %s591_s24]]  ;;  %s595_s28 = sadd.s32 35, %s1341_s30 }
  0x3c   : > { %v706_v33 = vadd.f32 %v705_v32, %v703_v40  ;;  %v707_v49 = vadd.f32 %v705_v32, %v704_v41  ;;  %v729_v38 = vmul.f32 %v1423_v18, %v728_v16  ;;  %v730_v51 = vmul.f32 %v1425_v19, %v728_v16  ;;  %s1559_s12 = sld [smem:[#allocation6 + %s593_s17]]  ;;  %s581_s13 = sadd.s32 28, %s1341_s30 }
  0x3d   : > { %v734_v17 = vmul.f32 %v1431_v21, %v733_v50  ;;  %v735_v52 = vmul.f32 %v1433_v22, %v733_v50  ;;  %v740_v57 = vstv %s1509_s20  ;;  %v1118_v18 = vunpack.c.l.bf16 %v1544_v48  ;;  %s1566_s14 = sld [smem:[#allocation6 + %s595_s28]]  ;;  %s583_s26 = sadd.s32 29, %s1341_s30 }
  0x3e   : > { %v708_v55 = vmul.f32 %v706_v33, %v706_v33  ;;  %v709_v56 = vmul.f32 %v707_v49, %v707_v49  ;;  %v731_v19 = vadd.f32 %v729_v38, %v726_v43  ;;  %v732_v21 = vadd.f32 %v730_v51, %v727_v47  ;;  %s1576_s20 = sld [smem:[#allocation6 + %s579_s19]]  ;;  %s597_s11 = sadd.s32 36, %s1341_s30 }
  0x3f   : > { %v1119_v22 = vunpack.c.h.bf16 %v1544_v48  ;;  %v762_v62 = vmul.f32 1.442695, %v759_v53  ;;  %v1572_v63 = vunpack.c.l.bf16 %v1121_v54  ;;  %v1579_v2 = vunpack.c.h.bf16 %v1121_v54  ;;  %s1583_s15 = sld [smem:[#allocation6 + %s581_s13]]  ;;  %s1103_s0 = sshll.u32 %s1743_s21, 4 }
  0x40   : > { %v710_v60 = vadd.f32 %v708_v55, %v675_v44  ;;  %v711_v61 = vadd.f32 %v709_v56, %v676_v45  ;;  %v736_v0 = vadd.f32 %v734_v17, %v731_v19  ;;  %v737_v1 = vadd.f32 %v735_v52, %v732_v21  ;;  %s1592_s16 = sld [smem:[#allocation6 + %s583_s26]]  ;;  %s599_s24 = sadd.s32 37, %s1341_s30 }
  0x41   : > { %v1581_v9 = vunpack.c.l.bf16 %v1138_v58  ;;  %1184 = vpow2.f32 %v762_v62  ;;  %v1585_v3 = vunpack.c.h.bf16 %v1138_v58  ;;  %v1587_v4 = vunpack.c.l.bf16 %v1139_v59  ;;  %s1598_s19 = sld [smem:[#allocation6 + %s597_s11]]  ;;  %s601_s17 = sadd.s32 38, %s1341_s30 }
  0x42   : > { %v1589_v8 = vunpack.c.h.bf16 %v1139_v59  ;;  %v738_v11 = vsub.f32 %v1535_v42, %v736_v0  ;;  %v739_v12 = vsub.f32 %v1541_v46, %v737_v1  ;;  %v778_v13 = vstv %s1522_s25  ;;  %s609_s28 = sadd.s32 42, %s1341_s30  ;;  %s585_s25 = sadd.s32 30, %s1341_s30 }
  0x43   : > { %v781_v14 = vstv %s1532_s2  ;;  %v779_v15 = vmul.f32 %v778_v13, %v1389_v5  ;;  %v780_v20 = vmul.f32 %v778_v13, %v1394_v6  ;;  %v786_v28 = vstv %s1538_s27  ;;  %s1612_s2 = sld [smem:[#allocation6 + %s609_s28]]  ;;  %s587_s13 = sadd.s32 31, %s1341_s30 }
  0x44   : > { %v782_v23 = vmul.f32 %v1399_v7, %v781_v14  ;;  %v783_v24 = vmul.f32 %v1409_v10, %v781_v14  ;;  %v741_v26 = vadd.f32 %v740_v57, %v738_v11  ;;  %v742_v27 = vadd.f32 %v740_v57, %v739_v12  ;;  %s1617_s26 = sld [smem:[#allocation6 + %s599_s24]]  ;;  %s589_s27 = sadd.s32 32, %s1341_s30 }
  0x45   : > { %v791_v29 = vstv %s1550_s29  ;;  %v794_v37 = vstv %s1559_s12  ;;  %v799_v39 = vstv %s1566_s14  ;;  %s1624_s29 = sld [smem:[#allocation6 + %s601_s17]]  ;;  %s611_s24 = sadd.s32 43, %s1341_s30  ;;  %v811_v52 = vstv %s1576_s20 }
  0x46   : > { %v784_v30 = vadd.f32 %v782_v23, %v779_v15  ;;  %v785_v31 = vadd.f32 %v783_v24, %v780_v20  ;;  %v792_v32 = vmul.f32 %v1572_v63, %v791_v29  ;;  %v793_v34 = vmul.f32 %v1579_v2, %v791_v29  ;;  %s1628_s11 = sld [smem:[#allocation6 + %s585_s25]]  ;;  %s603_s14 = sadd.s32 39, %s1341_s30 }
  0x47   : > { %v743_v35 = vmul.f32 %v741_v26, %v741_v26  ;;  %v744_v36 = vmul.f32 %v742_v27, %v742_v27  ;;  %v1621_v40 = vpop.eup %1184  ;;  %v795_v43 = vmul.f32 %v1581_v9, %v794_v37  ;;  %v796_v44 = vmul.f32 %v1585_v3, %v794_v37  ;;  %s1633_s12 = sld [smem:[#allocation6 + %s587_s13]]  ;;  %s605_s28 = sadd.s32 40, %s1341_s30 }
  0x48   : > { %v787_v41 = vadd.f32 %v786_v28, %v784_v30  ;;  %v788_v42 = vadd.f32 %v786_v28, %v785_v31  ;;  %v800_v47 = vmul.f32 %v1587_v4, %v799_v39  ;;  %v801_v33 = vmul.f32 %v1589_v8, %v799_v39  ;;  %s1638_s17 = sld [smem:[#allocation6 + %s589_s27]]  ;;  %s1652_s18 = scalar_lea.vmem %s1728_s10, %s1103_s0 }
  0x49   : > { %v745_v45 = vadd.f32 %v743_v35, %v710_v60  ;;  %v746_v46 = vadd.f32 %v744_v36, %v711_v61  ;;  %v797_v50 = vadd.f32 %v795_v43, %v792_v32  ;;  %v798_v38 = vadd.f32 %v796_v44, %v793_v34  ;;  %s1654_s27 = sld [smem:[#allocation6 + %s611_s24]] }
  0x4a   : > { %v789_v49 = vmul.f32 %v1605_v25, %v787_v41  ;;  %v790_v16 = vmul.f32 %v1621_v40, %v788_v42  ;;  %v814_v53 = vstv %s1583_s15  ;;  %v806_v56 = vstv %s1612_s2  ;;  %s1658_s3 = sld [smem:[#allocation6 + %s603_s14]]  ;;  %s607_s15 = sadd.s32 41, %s1341_s30 }
  0x4b   : > { %v751_v51 = vmul.f32 %v1118_v18, %v745_v45  ;;  %v752_v17 = vmul.f32 %v1119_v22, %v746_v46  ;;  %v802_v54 = vadd.f32 %v800_v47, %v797_v50  ;;  %v803_v55 = vadd.f32 %v801_v33, %v798_v38  ;;  %s1663_s20 = sld [smem:[#allocation6 + %s605_s28]] }
  0x4c   : > { %v812_v57 = vmul.f32 %v811_v52, %v1389_v5  ;;  %v813_v18 = vmul.f32 %v811_v52, %v1394_v6  ;;  %v815_v58 = vmul.f32 %v1399_v7, %v814_v53  ;;  %v816_v19 = vmul.f32 %v1409_v10, %v814_v53  ;;  %s1673_s0 = sld [smem:[#allocation6 + %s607_s15]] }
  0x4d   : > { %v754_v48 = vadd.f32 %v752_v17, %v751_v51  ;;  %v804_v21 = vsub.f32 %v789_v49, %v802_v54  ;;  %v805_v22 = vsub.f32 %v790_v16, %v803_v55  ;;  %v819_v59 = vstv %s1592_s16  ;;  %s613_s16 = sadd.s32 44, %s1341_s30 }
  0x4e   : > { %v824_v60 = vstv %s1598_s19  ;;  %v817_v61 = vadd.f32 %v815_v58, %v812_v57  ;;  %v818_v62 = vadd.f32 %v816_v19, %v813_v18  ;;  %v827_v11 = vstv %s1617_s26  ;;  %s1688_s30 = sld [smem:[#allocation6 + %s613_s16]] }
  0x4f   : > { %v825_v0 = vmul.f32 %v1572_v63, %v824_v60  ;;  %v826_v1 = vmul.f32 %v1579_v2, %v824_v60  ;;  %897 = vst [vmem:[%s1652_s18] sm:$0xff] %v754_v48  ;;  %v832_v12 = vstv %s1624_s29  ;;  %v828_v15 = vmul.f32 %v1581_v9, %v827_v11 }
  0x50   : > { %v820_v13 = vadd.f32 %v819_v59, %v817_v61  ;;  %v821_v14 = vadd.f32 %v819_v59, %v818_v62  ;;  %v829_v20 = vmul.f32 %v1585_v3, %v827_v11  ;;  %v807_v23 = vadd.f32 %v806_v56, %v804_v21 }
  0x51   : > { %v808_v24 = vadd.f32 %v806_v56, %v805_v22  ;;  %v833_v26 = vmul.f32 %v1587_v4, %v832_v12  ;;  %v834_v27 = vmul.f32 %v1589_v8, %v832_v12  ;;  %v830_v30 = vadd.f32 %v828_v15, %v825_v0 }
  0x52   : > { %v822_v28 = vmul.f32 %v1605_v25, %v820_v13  ;;  %v823_v29 = vmul.f32 %v1621_v40, %v821_v14  ;;  %v831_v31 = vadd.f32 %v829_v20, %v826_v1  ;;  %v839_v32 = vstv %s1654_s27 }
  0x53   : > { %v846_v34 = vstv %s1628_s11  ;;  %v849_v35 = vstv %s1633_s12  ;;  %v854_v36 = vstv %s1638_s17  ;;  %v835_v37 = vadd.f32 %v833_v26, %v830_v30 }
  0x54   : > { %v836_v39 = vadd.f32 %v834_v27, %v831_v31  ;;  %v847_v41 = vmul.f32 %v846_v34, %v1389_v5  ;;  %v848_v42 = vmul.f32 %v846_v34, %v1394_v6  ;;  %v850_v43 = vmul.f32 %v1399_v7, %v849_v35 }
  0x55   : > { %v851_v44 = vmul.f32 %v1409_v10, %v849_v35  ;;  %v859_v45 = vstv %s1658_s3  ;;  %v862_v46 = vstv %s1663_s20  ;;  %v837_v47 = vsub.f32 %v822_v28, %v835_v37  ;;  %s1737_s3 = sshll.u32 %s1743_s21, 3 }
  0x56   : > { %v838_v33 = vsub.f32 %v823_v29, %v836_v39  ;;  %v860_v49 = vmul.f32 %v1572_v63, %v859_v45  ;;  %v861_v16 = vmul.f32 %v1579_v2, %v859_v45  ;;  %v852_v50 = vadd.f32 %v850_v43, %v847_v41  ;;  %s518_s26 = scalar_lea.vmem %s1727_s9, %s1737_s3 }
  0x57   : > { %v853_v38 = vadd.f32 %v851_v44, %v848_v42  ;;  %v863_v5 = vmul.f32 %v1581_v9, %v862_v46  ;;  %v864_v6 = vmul.f32 %v1585_v3, %v862_v46  ;;  %v840_v51 = vadd.f32 %v839_v32, %v837_v47 }
  0x58   : > { %v841_v17 = vadd.f32 %v839_v32, %v838_v33  ;;  %v867_v7 = vstv %s1673_s0  ;;  %v855_v10 = vadd.f32 %v854_v36, %v852_v50  ;;  %v809_v2 = vmul.f32 %v807_v23, %v807_v23 }
  0x59   : > { %v856_v52 = vadd.f32 %v854_v36, %v853_v38  ;;  %v865_v53 = vadd.f32 %v863_v5, %v860_v49  ;;  %v866_v54 = vadd.f32 %v864_v6, %v861_v16  ;;  %v868_v55 = vmul.f32 %v1587_v4, %v867_v7 }
  0x5a   : > { %v869_v63 = vmul.f32 %v1589_v8, %v867_v7  ;;  %v810_v56 = vmul.f32 %v808_v24, %v808_v24  ;;  %v857_v57 = vmul.f32 %v1605_v25, %v855_v10  ;;  %v842_v3 = vmul.f32 %v840_v51, %v840_v51  ;;  %v1133_v8 = vld [vmem:[%s518_s26] sm:$0xff]  }
  0x5b   : > { %v858_v9 = vmul.f32 %v1621_v40, %v856_v52  ;;  %v843_v48 = vmul.f32 %v841_v17, %v841_v17  ;;  %v870_v18 = vadd.f32 %v868_v55, %v865_v53  ;;  %v874_v19 = vstv %s1688_s30 }
  0x5c   : > { %v871_v58 = vadd.f32 %v869_v63, %v866_v54  ;;  %v844_v22 = vadd.f32 %v842_v3, %v809_v2  ;;  %v1134_v62 = vunpack.c.l.bf16 %v1133_v8  ;;  %v1135_v0 = vunpack.c.h.bf16 %v1133_v8 }
  0x5d   : > { %v872_v21 = vsub.f32 %v857_v57, %v870_v18  ;;  %v845_v59 = vadd.f32 %v843_v48, %v810_v56 }
  0x5e   : > { %v873_v4 = vsub.f32 %v858_v9, %v871_v58 }
  0x5f   : > { %v875_v60 = vadd.f32 %v874_v19, %v872_v21 }
  0x60   : > { %v876_v25 = vadd.f32 %v874_v19, %v873_v4 }
  0x61   : > { %v877_v61 = vmul.f32 %v875_v60, %v875_v60 }
  0x62   : > { %v878_v40 = vmul.f32 %v876_v25, %v876_v25 }
  0x63   : > { %v879_v1 = vadd.f32 %v877_v61, %v844_v22 }
  0x64   : > { %v880_v11 = vadd.f32 %v878_v40, %v845_v59 }
  0x65   : > { %v885_v12 = vmul.f32 %v1134_v62, %v879_v1 }
  0x66   : > { %v886_v13 = vmul.f32 %v1135_v0, %v880_v11 }
  0x68   : > { %v889_v14 = vadd.f32 %v886_v13, %v885_v12 }
  0x6a   : > { %898 = vst [vmem:[%s1652_s18 + $0x8] sm:$0xff] %v889_v14 }
  0x6b PF: > { %s34_s23 = sadd.s32 1, %s1253_s23   ;;  %s1738_s21 = smov %s1249_s22 }
  0x6c   : > { %p31_p10 = scmp.ge.s32.totalorder %s34_s23, 6   ;;  %s1739_s22 = smov %s1741_s1 }
  0x6e   :  { %33 = sbr.rel (!%p31_p10) target bundleno = 10 (0xa), region = 119 }
  0x73   :  { %920 = vsyncpa [#allocation7], 1 }
  0x74   :  { %922 = vsyncpa [#allocation7 + $0x1], 1 }

</bundles_post_ra>
